<compile_context>
chip_gen: v7x
topology: tpu7x:2x2x1
jax: 0.10.0
libtpu: 0.0.40
codegen_flags: <defaults>
</compile_context>

<pallas_src>
import math

import jax
import jax.numpy as jnp
from jax.experimental import pallas as pl
from jax.experimental.pallas import tpu as pltpu

LOG_STD_MAX = 2.0
LOG_STD_MIN = -20.0


def _round_up(x, m):
    return ((x + m - 1) // m) * m


def gaussian_actor_kernel(
    states_ref,   # (TB, S)         f32
    w1_ref,       # (S, H1)         bf16
    w2_ref,       # (H1, H2)        bf16
    wmu_ref,      # (H2, A)         bf16
    prow_ref,     # (1, H1+H2+2A+1) f32  = [b1 | b2 | bmu | sigma | logp_const]
    eps_ref,      # (TB, A)         f32  standard-normal noise
    out_ref,      # (TB, OUT_W)     f32  packed: [:, :A]=actions, [:, A]=logp
):
    H1 = w1_ref.shape[1]
    H2 = w2_ref.shape[1]
    A = wmu_ref.shape[1]

    prow = prow_ref[...]                                       # (1, PW) f32
    b1 = prow[:, 0:H1]                                         # (1, H1)
    b2 = prow[:, H1:H1 + H2]                                   # (1, H2)
    bmu = prow[:, H1 + H2:H1 + H2 + A]                         # (1, A)
    sigma = prow[:, H1 + H2 + A:H1 + H2 + 2 * A]               # (1, A)
    logp_const = prow[:, H1 + H2 + 2 * A:H1 + H2 + 2 * A + 1]  # (1, 1)

    # base_layers: Linear + Tanh, Linear + Tanh  (bf16 MXU operands, f32 acc;
    # tanh goes to the EUP, add/bias on the VPU in f32).
    x = states_ref[...].astype(jnp.bfloat16)
    h1 = jnp.tanh(
        jnp.dot(x, w1_ref[...], preferred_element_type=jnp.float32) + b1
    )
    h2 = jnp.tanh(
        jnp.dot(h1.astype(jnp.bfloat16), w2_ref[...],
                preferred_element_type=jnp.float32) + b2
    )

    # out_mean
    mu = jnp.dot(h2.astype(jnp.bfloat16), wmu_ref[...],
                 preferred_element_type=jnp.float32) + bmu

    # sample: raw_actions = mu + sigma * eps
    eps = eps_ref[...]
    actions = mu + sigma * eps

    # MultivariateNormal(diag) log_prob:
    #   -0.5 * sum(((a-mu)/sigma)^2) - sum(log sigma) - 0.5*A*log(2*pi)
    # ((a-mu)/sigma) == eps exactly, and the constant terms are precomputed
    # in the wrapper, so only the quadratic form remains per-sample.
    quad = jnp.sum(eps * eps, axis=-1, keepdims=True)           # (TB, 1)
    logp = logp_const - 0.5 * quad                              # (TB, 1)

    # Packed lane-dense output slab: actions in cols [0, A), logp in col A.
    # Remaining lanes are never read by the wrapper (sliced off), so we leave
    # them untouched instead of paying a full-block zero fill each step.
    out_ref[:, 0:A] = actions.astype(out_ref.dtype)
    out_ref[:, A:A + 1] = logp.astype(out_ref.dtype)


def _orthogonal(key, shape, dtype=jnp.float32):
    """Deterministic orthogonal init (matches torch.nn.init.orthogonal_ semantics)."""
    rows, cols = shape
    n = max(rows, cols)
    a = jax.random.normal(key, (n, n), dtype=jnp.float32)
    q, r = jnp.linalg.qr(a)
    q = q * jnp.sign(jnp.diag(r))[None, :]
    return q[:rows, :cols].astype(dtype)


def init_gaussian_actor_params(key, state_dim, action_dim, layer_units=(32, 32)):
    k1, k2, k3, kb1, kb2, kb3 = jax.random.split(key, 6)
    h1, h2 = layer_units
    params = {
        # weights stored [in, out] and in bf16 (MXU-native); biases/logstd f32
        "w1": _orthogonal(k1, (h1, state_dim)).T.astype(jnp.bfloat16),
        "b1": (0.01 * jax.random.normal(kb1, (1, h1))).astype(jnp.float32),
        "w2": _orthogonal(k2, (h2, h1)).T.astype(jnp.bfloat16),
        "b2": (0.01 * jax.random.normal(kb2, (1, h2))).astype(jnp.float32),
        "wmu": _orthogonal(k3, (action_dim, h2)).T.astype(jnp.bfloat16),
        "bmu": (0.01 * jax.random.normal(kb3, (1, action_dim))).astype(jnp.float32),
        "logstd": (-0.5 * jnp.ones((1, action_dim), dtype=jnp.float32)),
    }
    return params


def gaussian_actor_forward(states, params, eps, tile_b=1024):
    """Returns (raw_actions [B, A], log_pis [B])."""
    B, S = states.shape
    H1 = params["w1"].shape[1]
    H2 = params["w2"].shape[1]
    A = params["wmu"].shape[1]

    # Per-parameter (not per-sample) math done once here:
    log_std = jnp.clip(params["logstd"].astype(jnp.float32), LOG_STD_MIN, LOG_STD_MAX)
    sigma = jnp.exp(log_std)                                              # (1, A)
    logp_const = -(jnp.sum(log_std) + 0.5 * A * math.log(2.0 * math.pi))  # scalar
    prow = jnp.concatenate(
        [params["b1"], params["b2"], params["bmu"], sigma,
         jnp.reshape(logp_const, (1, 1))],
        axis=-1,
    ).astype(jnp.float32)                                                 # (1, PW)
    PW = H1 + H2 + 2 * A + 1

    # Batch tiling (pad batch to a multiple of the tile).
    tb = min(tile_b, _round_up(B, 8))
    Bp = _round_up(B, tb)
    if Bp != B:
        states = jnp.pad(states, ((0, Bp - B), (0, 0)))
        eps = jnp.pad(eps, ((0, Bp - B), (0, 0)))

    OUT_W = max(128, _round_up(A + 1, 128))   # lane-dense packed output width
    grid = (Bp // tb,)

    out = pl.pallas_call(
        gaussian_actor_kernel,
        out_shape=jax.ShapeDtypeStruct((Bp, OUT_W), jnp.float32),
        grid=grid,
        in_specs=[
            pl.BlockSpec((tb, S), lambda i: (i, 0)),     # states: tiled over batch
            pl.BlockSpec((S, H1), lambda i: (0, 0)),     # weights: same block each step
            pl.BlockSpec((H1, H2), lambda i: (0, 0)),
            pl.BlockSpec((H2, A), lambda i: (0, 0)),
            pl.BlockSpec((1, PW), lambda i: (0, 0)),     # fused param row
            pl.BlockSpec((tb, A), lambda i: (i, 0)),     # eps: tiled over batch
        ],
        out_specs=pl.BlockSpec((tb, OUT_W), lambda i: (i, 0)),
        compiler_params=pltpu.CompilerParams(
            dimension_semantics=("parallel",),
        ),
        cost_estimate=pl.CostEstimate(
            flops=2 * Bp * (S * H1 + H1 * H2 + H2 * A) + 6 * Bp * A,
            transcendentals=Bp * (H1 + H2),
            bytes_accessed=(4 * Bp * (S + A + OUT_W)
                            + 2 * (S * H1 + H1 * H2 + H2 * A)
                            + 4 * PW),
        ),
    )(states, params["w1"], params["w2"], params["wmu"], prow, eps)

    actions = out[:B, :A]
    log_pis = out[:B, A]
    return actions, log_pis


def _reference_forward(states, params, eps):
    """Pure-JAX f32 reference of the same math (for sanity checking)."""
    w1 = params["w1"].astype(jnp.float32)
    w2 = params["w2"].astype(jnp.float32)
    wmu = params["wmu"].astype(jnp.float32)
    h1 = jnp.tanh(states @ w1 + params["b1"])
    h2 = jnp.tanh(h1 @ w2 + params["b2"])
    mu = h2 @ wmu + params["bmu"]
    log_std = jnp.clip(params["logstd"], LOG_STD_MIN, LOG_STD_MAX)
    sigma = jnp.exp(log_std)
    actions = mu + sigma * eps
    A = mu.shape[-1]
    z = (actions - mu) / sigma
    logp = (
        -0.5 * jnp.sum(z * z, axis=-1)
        - jnp.sum(log_std)
        - 0.5 * A * math.log(2.0 * math.pi)
    )
    return actions, logp


if __name__ == "__main__":
    # Small shapes consistent with the module: states [B, state_dim]
    batch = 8
    state_dim = 16
    action_dim = 4
    layer_units = (32, 32)

    key = jax.random.PRNGKey(0)
    k_params, k_states, k_eps = jax.random.split(key, 3)

    params = init_gaussian_actor_params(k_params, state_dim, action_dim, layer_units)
    states = jax.random.normal(k_states, (batch, state_dim), dtype=jnp.float32)
    eps = jax.random.normal(k_eps, (batch, action_dim), dtype=jnp.float32)

    actions, log_pis = gaussian_actor_forward(states, params, eps)
    jax.block_until_ready((actions, log_pis))

    ref_actions, ref_logp = _reference_forward(states, params, eps)
    assert actions.shape == (batch, action_dim)
    assert log_pis.shape == (batch,)
    # Actions go through bf16 MXU operands -> looser tolerance than pure f32.
    assert jnp.allclose(actions, ref_actions, atol=1e-1, rtol=1e-1)
    # log_prob depends only on eps + precomputed f32 constants -> tight.
    assert jnp.allclose(log_pis, ref_logp, atol=1e-4, rtol=1e-4)

    print("KERNEL_OK")
</pallas_src>

<mosaic_0001>
module attributes {stable_mosaic.version = 11 : i64} {
  func.func @gaussian_actor_kernel(%arg0: i32, %arg1: memref<8x16xf32, #tpu.memory_space<vmem>>, %arg2: memref<16x32xbf16, #tpu.memory_space<vmem>>, %arg3: memref<32x32xbf16, #tpu.memory_space<vmem>>, %arg4: memref<32x4xbf16, #tpu.memory_space<vmem>>, %arg5: memref<1x73xf32, #tpu.memory_space<vmem>>, %arg6: memref<8x4xf32, #tpu.memory_space<vmem>>, %arg7: memref<8x128xf32, #tpu.memory_space<vmem>>) attributes {dimension_semantics = [#tpu.dimension_semantics<parallel>], iteration_bounds = array<i64: 1>, scalar_prefetch = 0 : i64, scratch_operands = 0 : i64, tpu.core_type = #tpu.core_type<tc>, window_params = [{transform_indices = @transform_0, window_bounds = array<i64: 8, 16>}, {pipeline_mode = #tpu.pipeline_mode<synchronous>, transform_indices = @transform_1, window_bounds = array<i64: 16, 32>}, {pipeline_mode = #tpu.pipeline_mode<synchronous>, transform_indices = @transform_2, window_bounds = array<i64: 32, 32>}, {pipeline_mode = #tpu.pipeline_mode<synchronous>, transform_indices = @transform_3, window_bounds = array<i64: 32, 4>}, {pipeline_mode = #tpu.pipeline_mode<synchronous>, transform_indices = @transform_4, window_bounds = array<i64: 1, 73>}, {transform_indices = @transform_5, window_bounds = array<i64: 8, 4>}, {transform_indices = @transform_6, window_bounds = array<i64: 8, 128>}]} {
    %c0 = arith.constant 0 : index
    %c0_0 = arith.constant 0 : index
    %0 = vector.load %arg5[%c0, %c0_0] : memref<1x73xf32, #tpu.memory_space<vmem>>, vector<1x73xf32>
    %1 = vector.extract_strided_slice %0 {offsets = [0, 0], sizes = [1, 32], strides = [1, 1]} : vector<1x73xf32> to vector<1x32xf32>
    %2 = vector.extract_strided_slice %0 {offsets = [0, 32], sizes = [1, 32], strides = [1, 1]} : vector<1x73xf32> to vector<1x32xf32>
    %3 = vector.extract_strided_slice %0 {offsets = [0, 64], sizes = [1, 4], strides = [1, 1]} : vector<1x73xf32> to vector<1x4xf32>
    %4 = vector.extract_strided_slice %0 {offsets = [0, 68], sizes = [1, 4], strides = [1, 1]} : vector<1x73xf32> to vector<1x4xf32>
    %5 = vector.extract_strided_slice %0 {offsets = [0, 72], sizes = [1, 1], strides = [1, 1]} : vector<1x73xf32> to vector<1x1xf32>
    %c0_1 = arith.constant 0 : index
    %c0_2 = arith.constant 0 : index
    %6 = vector.load %arg1[%c0_1, %c0_2] : memref<8x16xf32, #tpu.memory_space<vmem>>, vector<8x16xf32>
    %7 = arith.truncf %6 : vector<8x16xf32> to vector<8x16xbf16>
    %c0_3 = arith.constant 0 : index
    %c0_4 = arith.constant 0 : index
    %8 = vector.load %arg2[%c0_3, %c0_4] : memref<16x32xbf16, #tpu.memory_space<vmem>>, vector<16x32xbf16>
    %cst = arith.constant dense<0.000000e+00> : vector<8x32xf32>
    %9 = tpu.matmul %7, %8, %cst {dimension_numbers = #tpu.dot_dimension_numbers<[1], [0], [0], [1], [0, 0, 1, 1], [], []>} : vector<8x16xbf16>, vector<16x32xbf16>, vector<8x32xf32> -> vector<8x32xf32>
    %10 = vector.broadcast %1 : vector<1x32xf32> to vector<8x32xf32>
    %11 = arith.addf %9, %10 : vector<8x32xf32>
    %12 = math.tanh %11 : vector<8x32xf32>
    %13 = arith.truncf %12 : vector<8x32xf32> to vector<8x32xbf16>
    %c0_5 = arith.constant 0 : index
    %c0_6 = arith.constant 0 : index
    %14 = vector.load %arg3[%c0_5, %c0_6] : memref<32x32xbf16, #tpu.memory_space<vmem>>, vector<32x32xbf16>
    %cst_7 = arith.constant dense<0.000000e+00> : vector<8x32xf32>
    %15 = tpu.matmul %13, %14, %cst_7 {dimension_numbers = #tpu.dot_dimension_numbers<[1], [0], [0], [1], [0, 0, 1, 1], [], []>} : vector<8x32xbf16>, vector<32x32xbf16>, vector<8x32xf32> -> vector<8x32xf32>
    %16 = vector.broadcast %2 : vector<1x32xf32> to vector<8x32xf32>
    %17 = arith.addf %15, %16 : vector<8x32xf32>
    %18 = math.tanh %17 : vector<8x32xf32>
    %19 = arith.truncf %18 : vector<8x32xf32> to vector<8x32xbf16>
    %c0_8 = arith.constant 0 : index
    %c0_9 = arith.constant 0 : index
    %20 = vector.load %arg4[%c0_8, %c0_9] : memref<32x4xbf16, #tpu.memory_space<vmem>>, vector<32x4xbf16>
    %cst_10 = arith.constant dense<0.000000e+00> : vector<8x4xf32>
    %21 = tpu.matmul %19, %20, %cst_10 {dimension_numbers = #tpu.dot_dimension_numbers<[1], [0], [0], [1], [0, 0, 1, 1], [], []>} : vector<8x32xbf16>, vector<32x4xbf16>, vector<8x4xf32> -> vector<8x4xf32>
    %22 = vector.broadcast %3 : vector<1x4xf32> to vector<8x4xf32>
    %23 = arith.addf %21, %22 : vector<8x4xf32>
    %c0_11 = arith.constant 0 : index
    %c0_12 = arith.constant 0 : index
    %24 = vector.load %arg6[%c0_11, %c0_12] : memref<8x4xf32, #tpu.memory_space<vmem>>, vector<8x4xf32>
    %25 = vector.broadcast %4 : vector<1x4xf32> to vector<8x4xf32>
    %26 = arith.mulf %25, %24 : vector<8x4xf32>
    %27 = arith.addf %23, %26 : vector<8x4xf32>
    %28 = arith.mulf %24, %24 : vector<8x4xf32>
    %cst_13 = arith.constant dense<0.000000e+00> : vector<8xf32>
    %29 = vector.multi_reduction <add>, %28, %cst_13 [1] : vector<8x4xf32> to vector<8xf32>
    %30 = vector.shape_cast %29 : vector<8xf32> to vector<8x1xf32>
    %cst_14 = arith.constant 5.000000e-01 : f32
    %31 = vector.broadcast %cst_14 : f32 to vector<8x1xf32>
    %32 = arith.mulf %31, %30 : vector<8x1xf32>
    %33 = vector.broadcast %5 : vector<1x1xf32> to vector<8x1xf32>
    %34 = arith.subf %33, %32 : vector<8x1xf32>
    %c0_15 = arith.constant 0 : index
    %c0_16 = arith.constant 0 : index
    %35 = vector.load %arg7[%c0_15, %c0_16] : memref<8x128xf32, #tpu.memory_space<vmem>>, vector<8x4xf32>
    tpu.vector_store %arg7[%c0_15, %c0_16], %27 {strides = array<i32>} : memref<8x128xf32, #tpu.memory_space<vmem>>, vector<8x4xf32>,
    %c0_17 = arith.constant 0 : index
    %c4 = arith.constant 4 : index
    %36 = vector.load %arg7[%c0_17, %c4] : memref<8x128xf32, #tpu.memory_space<vmem>>, vector<8x1xf32>
    tpu.vector_store %arg7[%c0_17, %c4], %34 {strides = array<i32>} : memref<8x128xf32, #tpu.memory_space<vmem>>, vector<8x1xf32>,
    return
  }
  func.func @transform_0(%arg0: i32) -> (i32, i32) {
    %c0_i32 = arith.constant 0 : i32
    %c0_i32_0 = arith.constant 0 : i32
    return %arg0, %c0_i32 : i32, i32
  }
  func.func @transform_1(%arg0: i32) -> (i32, i32) {
    %c0_i32 = arith.constant 0 : i32
    %c0_i32_0 = arith.constant 0 : i32
    %c0_i32_1 = arith.constant 0 : i32
    return %c0_i32, %c0_i32_0 : i32, i32
  }
  func.func @transform_2(%arg0: i32) -> (i32, i32) {
    %c0_i32 = arith.constant 0 : i32
    %c0_i32_0 = arith.constant 0 : i32
    %c0_i32_1 = arith.constant 0 : i32
    return %c0_i32, %c0_i32_0 : i32, i32
  }
  func.func @transform_3(%arg0: i32) -> (i32, i32) {
    %c0_i32 = arith.constant 0 : i32
    %c0_i32_0 = arith.constant 0 : i32
    %c0_i32_1 = arith.constant 0 : i32
    return %c0_i32, %c0_i32_0 : i32, i32
  }
  func.func @transform_4(%arg0: i32) -> (i32, i32) {
    %c0_i32 = arith.constant 0 : i32
    %c0_i32_0 = arith.constant 0 : i32
    %c0_i32_1 = arith.constant 0 : i32
    return %c0_i32, %c0_i32_0 : i32, i32
  }
  func.func @transform_5(%arg0: i32) -> (i32, i32) {
    %c0_i32 = arith.constant 0 : i32
    %c0_i32_0 = arith.constant 0 : i32
    return %arg0, %c0_i32 : i32, i32
  }
  func.func @transform_6(%arg0: i32) -> (i32, i32) {
    %c0_i32 = arith.constant 0 : i32
    %c0_i32_0 = arith.constant 0 : i32
    return %arg0, %c0_i32 : i32, i32
  }
}

</mosaic_0001>

<bundles_post_ra>
// kernel: tpu_custom_call.1
= control target key start
LH: loop header
LB: loop body
LE: loop exit
PB: predicated region body
PF: predicated region fallthrough
CT: control target
= control target key end

     0   :  { %v333_v1 = vmov 0.0   ;;  %vm42_vm0 = vcmask 130048   ;;  %vm334_vm1 = vmmov 0   ;;  %s415_s0 = inlined_call_operand.vmem [shape: f32[8,16], index: 0, kind: input, shape index: {}]   ;;  %s416_s1 = inlined_call_operand.vmem [shape: bf16[16,32], index: 1, kind: input, shape index: {}]   ;;  %s417_s2 = inlined_call_operand.vmem [shape: bf16[32,32], index: 2, kind: input, shape index: {}]   ;;  %s418_s3 = inlined_call_operand.vmem [shape: bf16[32,4], index: 3, kind: input, shape index: {}]   ;;  %s419_s4 = inlined_call_operand.vmem [shape: f32[1,73], index: 4, kind: input, shape index: {}]   ;;  %s420_s5 = inlined_call_operand.vmem [shape: f32[8,4], index: 5, kind: input, shape index: {}]   ;;  %s421_s6 = inlined_call_operand.hbm [shape: f32[8,128], index: 6, kind: output, shape index: {}]  }
   0x1   :  { %v300_v0 = vld [vmem:[%s416_s1] sm:$0xff]   ;;  %271 = vmatprep.subr.bf16.mxu0 %v333_v1  ;;  %277 = vmatprep.subr.bf16.mxu1 %v333_v1 }
   0x2   :  { %v26_v2 = vld [vmem:[%s415_s0] sm:$0xff]  ;;  %272 = vmatpush3.bf16.msra.mxu0 %v300_v0  ;;  %273 = vmatprep.mubr.msk.bf16.mxu0 %vm334_vm1, %v333_v1 }
   0x3   :  { %v27_v3 = vpack.c.bf16 %v26_v2, %v26_v2  ;;  %281 = vmatprep.mubr.msk.bf16.mxu1 %vm334_vm1, %v333_v1  ;;  %285 = vmatprep.subr.bf16.mxu0 %v333_v1 }
   0x4   :  { %11 = vsyncpa [#allocation3], 0  ;;  %v301_v4 = vld [vmem:[%s417_s2] sm:$0xff]   ;;  %v302_v5 = vld [vmem:[%s417_s2 + $0x8] sm:$0xff]   ;;  %s335_s7 = smov 96   ;;  %s336_s8 = smov 68  }
   0x5   :  { %274 = vmatmul.mubr.msk.bf16.vlgmr.msra.gmra.mrb[0].mxu0 %vm42_vm0, %v27_v3  ;;  %278 = vmatpush3.bf16.msra.mxu1 %v301_v4  ;;  %v254_v6 = vld [vmem:[%s419_s4] ss:$0 sm:$0xff]  ;;  %vm227_vm2 = vcmask 31744   ;;  %vm107_vm3 = vcmask 261120   ;;  %v304_v18 = vld [vmem:[%s418_s3 + $0x8] sm:$0xff]   ;;  %s337_s10 = smov 64  }
   0x6   :  { %289 = vmatprep.mubr.msk.bf16.mxu0 %vm334_vm1, %v333_v1  ;;  %279 = vmatprep.subr.bf16.mxu1 %v333_v1  ;;  %v215_v7 = vld [vmem:[%s420_s5] sm:$0xff]  ;;  %s338_s11 = smov 60   ;;  %vm238_vm4 = vcmask 39968  }
   0x7   :  { %104 = vrot.lane.b32.xlu0 %v254_v6, %s335_s7  ;;  %217 = vrot.lane.b32.xlu1 %v215_v7, %s336_s8  ;;  %v226_v8 = vmul.f32 %v215_v7, %v215_v7  ;;  %v303_v17 = vld [vmem:[%s418_s3] sm:$0xff]   ;;  %s339_s3 = smov [#allocation2]  }
   0x8   :  { %286 = vmatpush3.bf16.msra.mxu0 %v303_v17  ;;  %s246_s12 = sshll.u32 %s339_s3, 4  ;;  %s247_s12 = int_to_ptr.vmem [resolvable:$true] %s246_s12 }
   0x9   :  { %280 = vmatpush3.bf16.msra.mxu1 %v302_v5  ;;  %v228_v9 = vsel %vm227_vm2, %v226_v8, 0.0  ;;  %287 = vmatprep.subr.bf16.mxu0 %v333_v1  ;;  %s309_s13 = scalar_lea.vmem %s247_s12, 128  ;;  %p314_p1 = scmp.lt.s32.totalorder %s247_s12, %s247_s12 }
   0xa   :  { %p310_p0 = scmp.ne.s32.totalorder %s247_s12, %s309_s13  ;;  %p315_p2 = scmp.lt.s32.totalorder %s309_s13, %s309_s13 }
   0xb   :  { %169 = vrot.lane.b32.xlu1 %v254_v6, %s337_s10 }
   0xc   :  { %288 = vmatpush3.bf16.msra.mxu0 %v304_v18  ;;  %p316_p3 = por %p315_p2, %p314_p1 }
   0xe   :  { %p317_p4 = pnand %p316_p3, %p310_p0 }
  0x26   :  { %229 = vadd.xlane.f32.xlu0 %v228_v9 }
  0x79   :  { %v105_v19 = vpop.permute.xlu0 %104  ;;  %v218_v20 = vpop.permute.xlu1 %217 }
  0x7a   :  { %v220_v22 = vmul.f32 %v254_v6, %v218_v20 }
  0x7c   :  { %222 = vrot.lane.b32.xlu1 %v220_v22, %s338_s11 }
  0x7d   :  { %v170_v32 = vpop.permute.xlu1 %169 }
  0xb3   :  { %v230_v21 = vpop.xlane.xlu0 %229 }
  0xb4   :  { %v231_v23 = vmul.f32 0.5, %v230_v21 }
  0xb6   :  { %v232_v24 = vsub.f32 %v254_v6, %v231_v23 }
  0xb8   :  { %235 = vrot.lane.b32.xlu1 %v232_v24, %s338_s11 }
  0xd8   :  { %v80_v10 = vpop.f32.mrb[0].mxu0 }
  0xd9   :  { %v81_v11 = vadd.f32 %v254_v6, %v80_v10  ;;  %v275_v12 = vpop.f32.mrb[1].mxu0 }
  0xda   :  { %v83_v13 = vpop.f32.mrb[2].mxu0 }
  0xdb   :  { %305 = vtanh.f32 %v81_v11  ;;  %v276_v14 = vpop.f32.mrb[3].mxu0 }
  0xe5   :  { %v306_v15 = vpop.eup %305 }
  0xe6   :  { %v87_v16 = vpack.c.bf16 %v306_v15, %v306_v15 }
  0xe8   :  { %282 = vmatmul.mubr.msk.bf16.vlgmr.msra.gmra.mrb[0].mxu1 %vm107_vm3, %v87_v16 }
  0xee   :  { %v223_v33 = vpop.permute.xlu1 %222 }
 0x12a   :  { %v236_v40 = vpop.permute.xlu1 %235 }
 0x1bb   :  { %v145_v25 = vpop.f32.mrb[0].mxu1 }
 0x1bc   :  { %v146_v26 = vadd.f32 %v145_v25, %v105_v19  ;;  %v283_v27 = vpop.f32.mrb[1].mxu1 }
 0x1bd   :  { %v148_v28 = vpop.f32.mrb[2].mxu1 }
 0x1be   :  { %307 = vtanh.f32 %v146_v26  ;;  %v284_v29 = vpop.f32.mrb[3].mxu1 }
 0x1c8   :  { %v308_v30 = vpop.eup %307 }
 0x1c9   :  { %v152_v31 = vpack.c.bf16 %v308_v30, %v308_v30 }
 0x1cb   :  { %290 = vmatmul.mubr.msk.bf16.vlgmr.msra.gmra.mrb[4].mxu0 %vm107_vm3, %v152_v31 }
 0x29e   :  { %v209_v34 = vpop.f32.mrb[4].mxu0 }
 0x29f   :  { %v210_v35 = vadd.f32 %v209_v34, %v170_v32  ;;  %v291_v36 = vpop.f32.mrb[5].mxu0 }
 0x2a0   :  { %v212_v37 = vpop.f32.mrb[6].mxu0 }
 0x2a1   :  { %v225_v38 = vadd.f32 %v223_v33, %v210_v35  ;;  %v292_v39 = vpop.f32.mrb[7].mxu0 }
 0x2a3   :  { %233 = vst.msk [vmem:[#allocation2] sm:$0xff] %vm227_vm2, %v225_v38 }
 0x2a4   :  { %239 = vst.msk [vmem:[#allocation2] sm:$0xff] %vm238_vm4, %v236_v40 }
 0x2a5   :  { %320 = shalt.err (!%p317_p4)
}
 0x2a6   :  { %s321_s16 = scalar_lea.hbm %s421_s6, 128 }
 0x2a7   :  { %p322_p5 = scmp.ne.s32.totalorder %s421_s6, %s321_s16  ;;  %p325_p6 = scmp.lt.u32.totalorder %s321_s16, %s421_s6 }
 0x2a9   :  { %p327_p7 = pnand %p325_p6, %p322_p5 }
 0x2ab   :  { %330 = shalt.err (!%p327_p7)
}
 0x2ac   :  { %249 = dma.vmem_to_hbm [thread:$0]  %s247_s12, 128, %s421_s6, [#allocation3]  }
 0x2ad   :  { %331 = dma.done.wait [#allocation3], 128  }
 0x2ae   :  { %332 = vsyncadd [#allocation3], 4294967168 }
 0x2af   :  { %253 = vsyncpa [#allocation3], 1 }

</bundles_post_ra>
